<compile_context>
chip_gen: v6e
topology: v6e:2x2x1
jax: 0.10.0
libtpu: 0.0.40
codegen_flags: <defaults>
</compile_context>

<pallas_src>
import jax
import jax.numpy as jnp
from jax.experimental import pallas as pl
from jax.experimental.pallas import tpu as pltpu


def _round_up(n, m):
    return -(-n // m) * m


# --------------------------------------------------------------------------
# Parameter packing (done once, off the per-call path)
# --------------------------------------------------------------------------
def pack_cnp_params(params, x_dim, y_dim):
    """Fold the z-projection into the encoder path and pack every weight and
    bias into ONE lane-dense (6*lanes + 8, lanes) f32 slab.

    Slab layout (rows):
      [0*L, 1*L) : W_enc0   rows 0:x_dim = we0_x, rows x_dim:x_dim+y_dim = we0_y,
                            row x_dim+y_dim (mask column) = 0, rest 0
      [1*L, 2*L) : W_enc1   rows 0:h0 = we1
      [2*L, 3*L) : W_z      rows 0:h1 = weo @ wd0z   (folded z-projection)
      [3*L, 4*L) : W_dec0   rows 0:x_dim = wd0x
      [4*L, 5*L) : W_dec1   rows 0:h0 = wd1
      [5*L, 6*L) : W_out    rows 0:h1 = wdo
      [6*L, 6*L+8): biases  row 0=be0, 1=be1, 2=bd0+beo@wd0z, 3=bd1, 4=bdo
    All blocks are zero-padded to `lanes`(=128) columns, so padded activation
    lanes stay exactly zero through every layer.
    """
    (we0, be0, we1, be1, weo, beo,
     wd0z, wd0x, bd0, wd1, bd1, wdo, bdo) = [p.astype(jnp.float32) for p in params]
    h0 = we0.shape[1]
    h1 = we1.shape[1]

    lanes = _round_up(max(128, h0, h1, y_dim, x_dim + y_dim + 1), 128)

    hi = jax.lax.Precision.HIGHEST
    # Algebraic fold:  z @ wd0z = hbar @ (weo @ wd0z) + beo @ wd0z
    w_zfold = jnp.dot(weo, wd0z, precision=hi)            # (h1, h0)
    bd0_eff = bd0 + jnp.dot(beo, wd0z, precision=hi)      # (1, h0)

    def block(w):
        out = jnp.zeros((lanes, lanes), jnp.float32)
        return out.at[:w.shape[0], :w.shape[1]].set(w)

    w_enc0 = jnp.zeros((lanes, lanes), jnp.float32)
    w_enc0 = w_enc0.at[:x_dim, :h0].set(we0[:x_dim])               # x part
    w_enc0 = w_enc0.at[x_dim:x_dim + y_dim, :h0].set(we0[x_dim:])  # y part
    # row x_dim+y_dim (the mask column) stays zero.

    w_blocks = [w_enc0, block(we1), block(w_zfold),
                block(wd0x), block(wd1), block(wdo)]

    bias = jnp.zeros((8, lanes), jnp.float32)
    for i, b in enumerate((be0, be1, bd0_eff, bd1, bdo)):
        bias = bias.at[i, :b.shape[1]].set(b[0])

    w_slab = jnp.concatenate(w_blocks + [bias], axis=0)   # (6*lanes + 8, lanes)

    layout = dict(x_dim=x_dim, y_dim=y_dim, h0=h0, h1=h1, lanes=lanes,
                  mask_col=x_dim + y_dim, bias_off=6 * lanes)
    return w_slab, layout


# --------------------------------------------------------------------------
# Kernel
# --------------------------------------------------------------------------
def _make_kernel(layout, n_ctx_p, n_tgt_p):
    L = layout["lanes"]
    mcol = layout["mask_col"]
    boff = layout["bias_off"]
    f32 = jnp.float32

    def kernel(act_ref, w_ref, out_ref):
        ctx = act_ref[0:n_ctx_p, :]                          # (n_ctx_p, L)
        xt = act_ref[n_ctx_p:n_ctx_p + n_tgt_p, :]           # (n_tgt_p, L)

        def w(i):
            return w_ref[i * L:(i + 1) * L, :]               # (L, L), tile-aligned

        def b(i):
            return w_ref[boff + i:boff + i + 1, :]            # (1, L)

        # ---------------- Encoder MLP (concat folded into one slab dot) -----
        h = jnp.maximum(jnp.dot(ctx, w(0), preferred_element_type=f32) + b(0), 0.0)
        h = jnp.maximum(jnp.dot(h, w(1), preferred_element_type=f32) + b(1), 0.0)

        # -------- masked mean over context + fused z-projection -------------
        # mask column already scaled by 1/clamp(valid_count, 1) in the wrapper.
        m = ctx[:, mcol:mcol + 1]                              # (n_ctx_p, 1)
        hbar = jnp.sum(h * m, axis=0, keepdims=True)           # (1, L)
        zproj = jnp.dot(hbar, w(2), preferred_element_type=f32)  # (1, L)

        # ---------------- Decoder MLP ---------------------------------------
        d = jnp.maximum(
            jnp.dot(xt, w(3), preferred_element_type=f32) + zproj + b(2), 0.0)
        d = jnp.maximum(jnp.dot(d, w(4), preferred_element_type=f32) + b(3), 0.0)
        out_ref[...] = jnp.dot(d, w(5), preferred_element_type=f32) + b(4)

    return kernel


# --------------------------------------------------------------------------
# Wrapper
# --------------------------------------------------------------------------
def make_cnp_forward(layout):
    x_dim, y_dim = layout["x_dim"], layout["y_dim"]
    L = layout["lanes"]
    mcol = layout["mask_col"]

    def forward(x_context, y_context, y_context_valid, x_target, w_slab):
        n_ctx = x_context.shape[0]
        n_tgt = x_target.shape[0]
        n_ctx_p = _round_up(n_ctx, 8)     # keep every slice on whole sublane tiles
        n_tgt_p = _round_up(n_tgt, 8)

        mask = y_context_valid.astype(jnp.float32)               # (n_ctx, 1)
        # Reciprocal of the valid count, clamped so an all-invalid context
        # cannot produce inf/NaN; folded directly into the mask column.
        inv_n = 1.0 / jnp.maximum(jnp.sum(mask), 1.0)

        ctx_slab = jnp.zeros((n_ctx_p, L), jnp.float32)
        ctx_slab = ctx_slab.at[:n_ctx, :x_dim].set(x_context.astype(jnp.float32))
        ctx_slab = ctx_slab.at[:n_ctx, x_dim:x_dim + y_dim].set(
            y_context.astype(jnp.float32))
        ctx_slab = ctx_slab.at[:n_ctx, mcol:mcol + 1].set(mask * inv_n)

        tgt_slab = jnp.zeros((n_tgt_p, L), jnp.float32)
        tgt_slab = tgt_slab.at[:n_tgt, :x_dim].set(x_target.astype(jnp.float32))

        act = jnp.concatenate([ctx_slab, tgt_slab], axis=0)      # (n_ctx_p+n_tgt_p, L)

        kernel = _make_kernel(layout, n_ctx_p, n_tgt_p)

        flops = 2 * L * L * (2 * n_ctx_p + 1 + 3 * n_tgt_p)
        bytes_accessed = 4 * (act.size + w_slab.size + n_tgt_p * L)

        vmem = pl.BlockSpec(memory_space=pltpu.MemorySpace.VMEM)
        out = pl.pallas_call(
            kernel,
            out_shape=jax.ShapeDtypeStruct((n_tgt_p, L), jnp.float32),
            in_specs=[vmem, vmem],
            out_specs=vmem,
            cost_estimate=pl.CostEstimate(flops=flops, transcendentals=0,
                                          bytes_accessed=bytes_accessed),
        )(act, w_slab)
        return out[:n_tgt, :y_dim]

    return forward


# --------------------------------------------------------------------------
# Pure-JAX reference (mirrors the PyTorch forward in eval mode)
# --------------------------------------------------------------------------
def cnp_forward_ref(x_context, y_context, y_context_valid, x_target, params):
    (we0, be0, we1, be1, weo, beo,
     wd0z, wd0x, bd0, wd1, bd1, wdo, bdo) = params
    # Encoder
    x = jnp.concatenate([x_context, y_context], axis=-1)
    x = jax.nn.relu(x @ we0 + be0)
    x = jax.nn.relu(x @ we1 + be1)
    x = x @ weo + beo
    x = jnp.where(y_context_valid, x, 0.0)
    z = x.sum(axis=0, keepdims=True) / y_context_valid.sum()
    # Decoder
    zr = jnp.repeat(z, x_target.shape[0], axis=0)
    wd0 = jnp.concatenate([wd0z, wd0x], axis=0)
    d = jnp.concatenate([zr, x_target], axis=1)
    d = jax.nn.relu(d @ wd0 + bd0)
    d = jax.nn.relu(d @ wd1 + bd1)
    return d @ wdo + bdo


def init_params(key, x_dim, y_dim, hidden_dims, repr_dim):
    h0, h1 = hidden_dims
    ks = jax.random.split(key, 13)

    def w(k, shape, scale=0.1):
        return (scale * jax.random.normal(k, shape)).astype(jnp.float32)

    we0 = w(ks[0], (x_dim + y_dim, h0)); be0 = w(ks[1], (1, h0))
    we1 = w(ks[2], (h0, h1));            be1 = w(ks[3], (1, h1))
    weo = w(ks[4], (h1, repr_dim));      beo = w(ks[5], (1, repr_dim))
    wd0z = w(ks[6], (repr_dim, h0))
    wd0x = w(ks[7], (x_dim, h0));        bd0 = w(ks[8], (1, h0))
    wd1 = w(ks[9], (h0, h1));            bd1 = w(ks[10], (1, h1))
    wdo = w(ks[11], (h1, y_dim));        bdo = w(ks[12], (1, y_dim))
    return (we0, be0, we1, be1, weo, beo,
            wd0z, wd0x, bd0, wd1, bd1, wdo, bdo)


if __name__ == "__main__":
    # Small, forward-consistent shapes.
    x_dim, y_dim = 8, 4
    hidden_dims = (32, 32)
    repr_dim = 16

    key = jax.random.PRNGKey(0)
    k_p, k_rest = jax.random.split(key)
    params = init_params(k_p, x_dim, y_dim, hidden_dims, repr_dim)

    # Pack params once (folds the z-projection, builds the single slab).
    w_slab, layout = pack_cnp_params(params, x_dim, y_dim)
    w_slab = jax.block_until_ready(w_slab)

    cnp_forward = jax.jit(make_cnp_forward(layout))

    # Two test cases: tile-aligned and non-multiple-of-8 (exercises padding).
    for n_ctx, n_tgt in [(8, 8), (7, 10)]:
        k_rest, k_xc, k_yc, k_v, k_xt = jax.random.split(k_rest, 5)
        x_context = jax.random.normal(k_xc, (n_ctx, x_dim), dtype=jnp.float32)
        y_context = jax.random.normal(k_yc, (n_ctx, y_dim), dtype=jnp.float32)
        y_context_valid = jax.random.bernoulli(k_v, p=0.75, shape=(n_ctx, 1))
        y_context_valid = y_context_valid.at[0, 0].set(True)   # >=1 valid point
        x_target = jax.random.normal(k_xt, (n_tgt, x_dim), dtype=jnp.float32)

        y_pred = cnp_forward(x_context, y_context, y_context_valid, x_target,
                             w_slab)
        y_pred = jax.block_until_ready(y_pred)

        y_ref = cnp_forward_ref(x_context, y_context, y_context_valid,
                                x_target, params)

        assert y_pred.shape == (n_tgt, y_dim), y_pred.shape
        err = jnp.max(jnp.abs(y_pred - y_ref))
        assert jnp.allclose(y_pred, y_ref, atol=2e-4, rtol=2e-4), (
            f"max abs err {err} for shapes ctx={n_ctx}, tgt={n_tgt}")

    print("KERNEL_OK")
</pallas_src>

<mosaic_0001>
module attributes {stable_mosaic.version = 11 : i64} {
  func.func @kernel(%arg0: memref<16x128xf32, #tpu.memory_space<vmem>>, %arg1: memref<776x128xf32, #tpu.memory_space<vmem>>, %arg2: memref<8x128xf32, #tpu.memory_space<vmem>>) attributes {dimension_semantics = [], scalar_prefetch = 0 : i64, scratch_operands = 0 : i64, tpu.core_type = #tpu.core_type<tc>} {
    %c0 = arith.constant 0 : index
    %c0_0 = arith.constant 0 : index
    %0 = vector.load %arg0[%c0, %c0_0] : memref<16x128xf32, #tpu.memory_space<vmem>>, vector<8x128xf32>
    %c8 = arith.constant 8 : index
    %c0_1 = arith.constant 0 : index
    %1 = vector.load %arg0[%c8, %c0_1] : memref<16x128xf32, #tpu.memory_space<vmem>>, vector<8x128xf32>
    %c0_2 = arith.constant 0 : index
    %c0_3 = arith.constant 0 : index
    %2 = vector.load %arg1[%c0_2, %c0_3] : memref<776x128xf32, #tpu.memory_space<vmem>>, vector<128x128xf32>
    %cst = arith.constant dense<0.000000e+00> : vector<8x128xf32>
    %3 = tpu.matmul %0, %2, %cst {dimension_numbers = #tpu.dot_dimension_numbers<[1], [0], [0], [1], [0, 0, 1, 1], [], []>} : vector<8x128xf32>, vector<128x128xf32>, vector<8x128xf32> -> vector<8x128xf32>
    %c768 = arith.constant 768 : index
    %c0_4 = arith.constant 0 : index
    %4 = vector.load %arg1[%c768, %c0_4] : memref<776x128xf32, #tpu.memory_space<vmem>>, vector<1x128xf32>
    %5 = vector.broadcast %4 : vector<1x128xf32> to vector<8x128xf32>
    %6 = arith.addf %3, %5 : vector<8x128xf32>
    %cst_5 = arith.constant 0.000000e+00 : f32
    %7 = vector.broadcast %cst_5 : f32 to vector<8x128xf32>
    %8 = arith.maximumf %6, %7 : vector<8x128xf32>
    %c128 = arith.constant 128 : index
    %c0_6 = arith.constant 0 : index
    %9 = vector.load %arg1[%c128, %c0_6] : memref<776x128xf32, #tpu.memory_space<vmem>>, vector<128x128xf32>
    %cst_7 = arith.constant dense<0.000000e+00> : vector<8x128xf32>
    %10 = tpu.matmul %8, %9, %cst_7 {dimension_numbers = #tpu.dot_dimension_numbers<[1], [0], [0], [1], [0, 0, 1, 1], [], []>} : vector<8x128xf32>, vector<128x128xf32>, vector<8x128xf32> -> vector<8x128xf32>
    %c769 = arith.constant 769 : index
    %c0_8 = arith.constant 0 : index
    %11 = vector.load %arg1[%c769, %c0_8] : memref<776x128xf32, #tpu.memory_space<vmem>>, vector<1x128xf32>
    %12 = vector.broadcast %11 : vector<1x128xf32> to vector<8x128xf32>
    %13 = arith.addf %10, %12 : vector<8x128xf32>
    %cst_9 = arith.constant 0.000000e+00 : f32
    %14 = vector.broadcast %cst_9 : f32 to vector<8x128xf32>
    %15 = arith.maximumf %13, %14 : vector<8x128xf32>
    %16 = vector.extract_strided_slice %0 {offsets = [0, 12], sizes = [8, 1], strides = [1, 1]} : vector<8x128xf32> to vector<8x1xf32>
    %17 = vector.broadcast %16 : vector<8x1xf32> to vector<8x128xf32>
    %18 = arith.mulf %15, %17 : vector<8x128xf32>
    %cst_10 = arith.constant dense<0.000000e+00> : vector<128xf32>
    %19 = vector.multi_reduction <add>, %18, %cst_10 [0] : vector<8x128xf32> to vector<128xf32>
    %20 = vector.shape_cast %19 : vector<128xf32> to vector<1x128xf32>
    %c256 = arith.constant 256 : index
    %c0_11 = arith.constant 0 : index
    %21 = vector.load %arg1[%c256, %c0_11] : memref<776x128xf32, #tpu.memory_space<vmem>>, vector<128x128xf32>
    %cst_12 = arith.constant dense<0.000000e+00> : vector<1x128xf32>
    %22 = tpu.matmul %20, %21, %cst_12 {dimension_numbers = #tpu.dot_dimension_numbers<[1], [0], [0], [1], [0, 0, 1, 1], [], []>} : vector<1x128xf32>, vector<128x128xf32>, vector<1x128xf32> -> vector<1x128xf32>
    %c384 = arith.constant 384 : index
    %c0_13 = arith.constant 0 : index
    %23 = vector.load %arg1[%c384, %c0_13] : memref<776x128xf32, #tpu.memory_space<vmem>>, vector<128x128xf32>
    %cst_14 = arith.constant dense<0.000000e+00> : vector<8x128xf32>
    %24 = tpu.matmul %1, %23, %cst_14 {dimension_numbers = #tpu.dot_dimension_numbers<[1], [0], [0], [1], [0, 0, 1, 1], [], []>} : vector<8x128xf32>, vector<128x128xf32>, vector<8x128xf32> -> vector<8x128xf32>
    %25 = vector.broadcast %22 : vector<1x128xf32> to vector<8x128xf32>
    %26 = arith.addf %24, %25 : vector<8x128xf32>
    %c770 = arith.constant 770 : index
    %c0_15 = arith.constant 0 : index
    %27 = vector.load %arg1[%c770, %c0_15] : memref<776x128xf32, #tpu.memory_space<vmem>>, vector<1x128xf32>
    %28 = vector.broadcast %27 : vector<1x128xf32> to vector<8x128xf32>
    %29 = arith.addf %26, %28 : vector<8x128xf32>
    %cst_16 = arith.constant 0.000000e+00 : f32
    %30 = vector.broadcast %cst_16 : f32 to vector<8x128xf32>
    %31 = arith.maximumf %29, %30 : vector<8x128xf32>
    %c512 = arith.constant 512 : index
    %c0_17 = arith.constant 0 : index
    %32 = vector.load %arg1[%c512, %c0_17] : memref<776x128xf32, #tpu.memory_space<vmem>>, vector<128x128xf32>
    %cst_18 = arith.constant dense<0.000000e+00> : vector<8x128xf32>
    %33 = tpu.matmul %31, %32, %cst_18 {dimension_numbers = #tpu.dot_dimension_numbers<[1], [0], [0], [1], [0, 0, 1, 1], [], []>} : vector<8x128xf32>, vector<128x128xf32>, vector<8x128xf32> -> vector<8x128xf32>
    %c771 = arith.constant 771 : index
    %c0_19 = arith.constant 0 : index
    %34 = vector.load %arg1[%c771, %c0_19] : memref<776x128xf32, #tpu.memory_space<vmem>>, vector<1x128xf32>
    %35 = vector.broadcast %34 : vector<1x128xf32> to vector<8x128xf32>
    %36 = arith.addf %33, %35 : vector<8x128xf32>
    %cst_20 = arith.constant 0.000000e+00 : f32
    %37 = vector.broadcast %cst_20 : f32 to vector<8x128xf32>
    %38 = arith.maximumf %36, %37 : vector<8x128xf32>
    %c640 = arith.constant 640 : index
    %c0_21 = arith.constant 0 : index
    %39 = vector.load %arg1[%c640, %c0_21] : memref<776x128xf32, #tpu.memory_space<vmem>>, vector<128x128xf32>
    %cst_22 = arith.constant dense<0.000000e+00> : vector<8x128xf32>
    %40 = tpu.matmul %38, %39, %cst_22 {dimension_numbers = #tpu.dot_dimension_numbers<[1], [0], [0], [1], [0, 0, 1, 1], [], []>} : vector<8x128xf32>, vector<128x128xf32>, vector<8x128xf32> -> vector<8x128xf32>
    %c772 = arith.constant 772 : index
    %c0_23 = arith.constant 0 : index
    %41 = vector.load %arg1[%c772, %c0_23] : memref<776x128xf32, #tpu.memory_space<vmem>>, vector<1x128xf32>
    %42 = vector.broadcast %41 : vector<1x128xf32> to vector<8x128xf32>
    %43 = arith.addf %40, %42 : vector<8x128xf32>
    %c0_24 = arith.constant 0 : index
    %c0_25 = arith.constant 0 : index
    %44 = vector.load %arg2[%c0_24, %c0_25] : memref<8x128xf32, #tpu.memory_space<vmem>>, vector<8x128xf32>
    tpu.vector_store %arg2[%c0_24, %c0_25], %43 {strides = array<i32>} : memref<8x128xf32, #tpu.memory_space<vmem>>, vector<8x128xf32>,
    return
  }
}

</mosaic_0001>

<bundles_post_ra>
// kernel: forward.1
= control target key start
LH: loop header
LB: loop body
LE: loop exit
PB: predicated region body
PF: predicated region fallthrough
CT: control target
= control target key end

     0   :  { %7 = vsyncpa [#allocation3], 0  ;;  %s941_s9 = smov [#allocation2]   ;;  %s1082_s0 = inlined_call_operand.vmem [shape: f32[16,128], index: 0, kind: input, shape index: {}]   ;;  %s1083_s1 = inlined_call_operand.hbm [shape: f32[776,128], index: 1, kind: input, shape index: {}]   ;;  %s1084_s2 = inlined_call_operand.vmem [shape: f32[8,128], index: 2, kind: output, shape index: {}]  }
   0x1   :  { %s15_s10 = sshll.u32 %s941_s9, 4  ;;  %s16_s10 = int_to_ptr.vmem [resolvable:$true] %s15_s10 }
   0x2   :  { %s927_s11 = scalar_lea.vmem %s16_s10, 12416  ;;  %p932_p1 = scmp.lt.s32.totalorder %s16_s10, %s16_s10 }
   0x3   :  { %p928_p0 = scmp.ne.s32.totalorder %s16_s10, %s927_s11  ;;  %p933_p2 = scmp.lt.s32.totalorder %s927_s11, %s927_s11 }
   0x5   :  { %p934_p3 = por %p933_p2, %p932_p1 }
   0x7   :  { %p935_p4 = pnand %p934_p3, %p928_p0 }
   0x9   :  { %938 = shalt.err (!%p935_p4)
}
   0xa   :  { %s942_s12 = smov 128   ;;  %s943_s13 = smov 8  }
   0xb   :  { %21 = dma.hbm_to_vmem [thread:$0]  %s1083_s1, 12416, %s16_s10, [#allocation3], %s942_s12, %s942_s12, %s943_s13  }
   0xc   :  { %939 = dma.done.wait [#allocation3], 12416  }
   0xd   :  { %940 = vsyncadd [#allocation3], 4294954880  ;;  %v944_v0 = vmov 0.0   ;;  %vm945_vm0 = vmmov 0   ;;  %v42_v1 = vld [vmem:[#allocation2 + $0x78] sm:$0xff]  ;;  %v41_v2 = vld [vmem:[#allocation2 + $0x70] sm:$0xff] }
   0xe   :  { %702 = vmatprep.subr.mxu0 %v944_v0  ;;  %734 = vmatprep.mubr.msk.f32.mxu0 %vm945_vm0, %v944_v0  ;;  %v40_v3 = vld [vmem:[#allocation2 + $0x68] sm:$0xff]  ;;  %v39_v4 = vld [vmem:[#allocation2 + $0x60] sm:$0xff]  ;;  %v134_v5 = vld [vmem:[#allocation2 + $0xf8] sm:$0xff]  ;;  %v946_v35 = vmov 12  }
   0xf   :  { %737 = vmatprep.subr.mxu1 %v944_v0  ;;  %769 = vmatprep.mubr.msk.f32.mxu1 %vm945_vm0, %v944_v0  ;;  %v38_v6 = vld [vmem:[#allocation2 + $0x58] sm:$0xff]  ;;  %v133_v7 = vld [vmem:[#allocation2 + $0xf0] sm:$0xff]  ;;  %v132_v8 = vld [vmem:[#allocation2 + $0xe8] sm:$0xff] }
  0x10   :  { %703 = vmatpush3.msra.mxu0 %v42_v1  ;;  %738 = vmatpush3.msra.mxu1 %v134_v5  ;;  %v37_v9 = vld [vmem:[#allocation2 + $0x50] sm:$0xff]  ;;  %v131_v10 = vld [vmem:[#allocation2 + $0xe0] sm:$0xff]  ;;  %v36_v11 = vld [vmem:[#allocation2 + $0x48] sm:$0xff] }
  0x11   :  { %704 = vmatprep.subr.mxu0 %v944_v0  ;;  %739 = vmatprep.subr.mxu1 %v944_v0  ;;  %v130_v12 = vld [vmem:[#allocation2 + $0xd8] sm:$0xff]  ;;  %v35_v13 = vld [vmem:[#allocation2 + $0x40] sm:$0xff]  ;;  %v129_v14 = vld [vmem:[#allocation2 + $0xd0] sm:$0xff] }
  0x12   :  { %705 = vmatpush3.msra.mxu0 %v41_v2  ;;  %740 = vmatpush3.msra.mxu1 %v133_v7  ;;  %v34_v15 = vld [vmem:[#allocation2 + $0x38] sm:$0xff]  ;;  %v128_v16 = vld [vmem:[#allocation2 + $0xc8] sm:$0xff]  ;;  %v33_v17 = vld [vmem:[#allocation2 + $0x30] sm:$0xff] }
  0x13   :  { %706 = vmatprep.subr.mxu0 %v944_v0  ;;  %741 = vmatprep.subr.mxu1 %v944_v0  ;;  %v127_v18 = vld [vmem:[#allocation2 + $0xc0] sm:$0xff]  ;;  %v32_v19 = vld [vmem:[#allocation2 + $0x28] sm:$0xff]  ;;  %v126_v20 = vld [vmem:[#allocation2 + $0xb8] sm:$0xff] }
  0x14   :  { %707 = vmatpush3.msra.mxu0 %v40_v3  ;;  %742 = vmatpush3.msra.mxu1 %v132_v8  ;;  %v31_v21 = vld [vmem:[#allocation2 + $0x20] sm:$0xff]  ;;  %v125_v22 = vld [vmem:[#allocation2 + $0xb0] sm:$0xff]  ;;  %v30_v23 = vld [vmem:[#allocation2 + $0x18] sm:$0xff] }
  0x15   :  { %708 = vmatprep.subr.mxu0 %v944_v0  ;;  %743 = vmatprep.subr.mxu1 %v944_v0  ;;  %v124_v24 = vld [vmem:[#allocation2 + $0xa8] sm:$0xff]  ;;  %v29_v25 = vld [vmem:[#allocation2 + $0x10] sm:$0xff]  ;;  %v123_v26 = vld [vmem:[#allocation2 + $0xa0] sm:$0xff] }
  0x16   :  { %709 = vmatpush3.msra.mxu0 %v39_v4  ;;  %744 = vmatpush3.msra.mxu1 %v131_v10  ;;  %v28_v27 = vld [vmem:[#allocation2 + $0x8] sm:$0xff]  ;;  %v122_v28 = vld [vmem:[#allocation2 + $0x98] sm:$0xff]  ;;  %v27_v29 = vld [vmem:[#allocation2] sm:$0xff] }
  0x17   :  { %710 = vmatprep.subr.mxu0 %v944_v0  ;;  %745 = vmatprep.subr.mxu1 %v944_v0  ;;  %v25_v30 = vld [vmem:[%s1082_s0] sm:$0xff]  ;;  %v121_v31 = vld [vmem:[#allocation2 + $0x90] sm:$0xff]  ;;  %v120_v32 = vld [vmem:[#allocation2 + $0x88] sm:$0xff] }
  0x18   :  { %711 = vmatpush3.msra.mxu0 %v38_v6  ;;  %746 = vmatpush3.msra.mxu1 %v130_v12  ;;  %v119_v33 = vld [vmem:[#allocation2 + $0x80] sm:$0xff]  ;;  %v238_v34 = vld [vmem:[#allocation2 + $0x178] sm:$0xff]  ;;  %v237_v36 = vld [vmem:[#allocation2 + $0x170] sm:$0xff] }
  0x19   :  { %712 = vmatprep.subr.mxu0 %v944_v0  ;;  %747 = vmatprep.subr.mxu1 %v944_v0  ;;  %v236_v37 = vld [vmem:[#allocation2 + $0x168] sm:$0xff]  ;;  %v235_v38 = vld [vmem:[#allocation2 + $0x160] sm:$0xff]  ;;  %v234_v39 = vld [vmem:[#allocation2 + $0x158] sm:$0xff] }
  0x1a   :  { %713 = vmatpush3.msra.mxu0 %v37_v9  ;;  %748 = vmatpush3.msra.mxu1 %v129_v14  ;;  %v233_v40 = vld [vmem:[#allocation2 + $0x150] sm:$0xff]  ;;  %v595_v41 = vld [vmem:[#allocation2 + $0x300] ss:$0 sm:$0xff]  ;;  %v324_v46 = vld [vmem:[#allocation2 + $0x1f8] sm:$0xff] }
  0x1b   :  { %714 = vmatprep.subr.mxu0 %v944_v0  ;;  %749 = vmatprep.subr.mxu1 %v944_v0  ;;  %v323_v47 = vld [vmem:[#allocation2 + $0x1f0] sm:$0xff]  ;;  %v322_v48 = vld [vmem:[#allocation2 + $0x1e8] sm:$0xff]  ;;  %v321_v49 = vld [vmem:[#allocation2 + $0x1e0] sm:$0xff] }
  0x1c   :  { %715 = vmatpush3.msra.mxu0 %v36_v11  ;;  %750 = vmatpush3.msra.mxu1 %v128_v16  ;;  %v320_v50 = vld [vmem:[#allocation2 + $0x1d8] sm:$0xff]  ;;  %v319_v51 = vld [vmem:[#allocation2 + $0x1d0] sm:$0xff]  ;;  %v232_v52 = vld [vmem:[#allocation2 + $0x148] sm:$0xff] }
  0x1d   :  { %716 = vmatprep.subr.mxu0 %v944_v0  ;;  %751 = vmatprep.subr.mxu1 %v944_v0  ;;  %v318_v53 = vld [vmem:[#allocation2 + $0x1c8] sm:$0xff]  ;;  %v231_v54 = vld [vmem:[#allocation2 + $0x140] sm:$0xff]  ;;  %v230_v56 = vld [vmem:[#allocation2 + $0x138] sm:$0xff] }
  0x1e   :  { %717 = vmatpush3.msra.mxu0 %v35_v13  ;;  %752 = vmatpush3.msra.mxu1 %v127_v18  ;;  %v317_v55 = vld [vmem:[#allocation2 + $0x1c0] sm:$0xff]  ;;  %v316_v57 = vld [vmem:[#allocation2 + $0x1b8] sm:$0xff]  ;;  %v229_v58 = vld [vmem:[#allocation2 + $0x130] sm:$0xff] }
  0x1f   :  { %718 = vmatprep.subr.mxu0 %v944_v0  ;;  %753 = vmatprep.subr.mxu1 %v944_v0  ;;  %v315_v59 = vld [vmem:[#allocation2 + $0x1b0] sm:$0xff]  ;;  %v228_v60 = vld [vmem:[#allocation2 + $0x128] sm:$0xff]  ;;  %v227_v62 = vld [vmem:[#allocation2 + $0x120] sm:$0xff] }
  0x20   :  { %719 = vmatpush3.msra.mxu0 %v34_v15  ;;  %754 = vmatpush3.msra.mxu1 %v126_v20  ;;  %v314_v61 = vld [vmem:[#allocation2 + $0x1a8] sm:$0xff]  ;;  %v313_v63 = vld [vmem:[#allocation2 + $0x1a0] sm:$0xff]  ;;  %v226_v1 = vld [vmem:[#allocation2 + $0x118] sm:$0xff] }
  0x21   :  { %720 = vmatprep.subr.mxu0 %v944_v0  ;;  %755 = vmatprep.subr.mxu1 %v944_v0  ;;  %v312_v2 = vld [vmem:[#allocation2 + $0x198] sm:$0xff]  ;;  %v225_v3 = vld [vmem:[#allocation2 + $0x110] sm:$0xff]  ;;  %v224_v5 = vld [vmem:[#allocation2 + $0x108] sm:$0xff] }
  0x22   :  { %721 = vmatpush3.msra.mxu0 %v33_v17  ;;  %756 = vmatpush3.msra.mxu1 %v125_v22  ;;  %v311_v4 = vld [vmem:[#allocation2 + $0x190] sm:$0xff]  ;;  %v310_v6 = vld [vmem:[#allocation2 + $0x188] sm:$0xff]  ;;  %v223_v7 = vld [vmem:[#allocation2 + $0x100] sm:$0xff] }
  0x23   :  { %722 = vmatprep.subr.mxu0 %v944_v0  ;;  %757 = vmatprep.subr.mxu1 %v944_v0  ;;  %v309_v8 = vld [vmem:[#allocation2 + $0x180] sm:$0xff]  ;;  %v26_v9 = vld [vmem:[%s1082_s0 + $0x8] sm:$0xff] }
  0x24   :  { %723 = vmatpush3.msra.mxu0 %v32_v19  ;;  %758 = vmatpush3.msra.mxu1 %v124_v24  ;;  %v596_v10 = vld [vmem:[#allocation2 + $0x301] ss:$0 sm:$0xff]  ;;  %v420_v24 = vld [vmem:[#allocation2 + $0x270] sm:$0xff] }
  0x25   :  { %724 = vmatprep.subr.mxu0 %v944_v0  ;;  %759 = vmatprep.subr.mxu1 %v944_v0 }
  0x26   :  { %725 = vmatpush3.msra.mxu0 %v31_v21  ;;  %760 = vmatpush3.msra.mxu1 %v123_v26  ;;  %v418_v26 = vld [vmem:[#allocation2 + $0x260] sm:$0xff] }
  0x27   :  { %726 = vmatprep.subr.mxu0 %v944_v0  ;;  %761 = vmatprep.subr.mxu1 %v944_v0 }
  0x28   :  { %727 = vmatpush3.msra.mxu0 %v30_v23  ;;  %762 = vmatpush3.msra.mxu1 %v122_v28  ;;  %v421_v23 = vld [vmem:[#allocation2 + $0x278] sm:$0xff]  ;;  %v416_v28 = vld [vmem:[#allocation2 + $0x250] sm:$0xff] }
  0x29   :  { %728 = vmatprep.subr.mxu0 %v944_v0  ;;  %763 = vmatprep.subr.mxu1 %v944_v0 }
  0x2a   :  { %729 = vmatpush3.msra.mxu0 %v29_v25  ;;  %764 = vmatpush3.msra.mxu1 %v121_v31  ;;  %v419_v25 = vld [vmem:[#allocation2 + $0x268] sm:$0xff]  ;;  %v413_v31 = vld [vmem:[#allocation2 + $0x238] sm:$0xff] }
  0x2b   :  { %730 = vmatprep.subr.mxu0 %v944_v0  ;;  %765 = vmatprep.subr.mxu1 %v944_v0 }
  0x2c   :  { %731 = vmatpush3.msra.mxu0 %v28_v27  ;;  %766 = vmatpush3.msra.mxu1 %v120_v32  ;;  %v417_v27 = vld [vmem:[#allocation2 + $0x258] sm:$0xff]  ;;  %v412_v32 = vld [vmem:[#allocation2 + $0x230] sm:$0xff] }
  0x2d   :  { %732 = vmatprep.subr.mxu0 %v944_v0  ;;  %767 = vmatprep.subr.mxu1 %v944_v0 }
  0x2e   :  { %733 = vmatpush3.msra.mxu0 %v27_v29  ;;  %768 = vmatpush3.msra.mxu1 %v119_v33  ;;  %v415_v29 = vld [vmem:[#allocation2 + $0x248] sm:$0xff] }
  0x2f   :  { %735 = vmatmul.mubr.f32.vlgmr.msra.gmra.mxu0 %v25_v30  ;;  %772 = vmatprep.subr.mxu0 %v944_v0  ;;  %v411_v33 = vld [vmem:[#allocation2 + $0x228] sm:$0xff] }
  0x30   :  { %804 = vmatprep.mubr.msk.f32.mxu0 %vm945_vm0, %v944_v0  ;;  %807 = vmatprep.subr.mxu1 %v944_v0 }
  0x31   :  { %918 = vset.pattern.permute.xlu0 %v946_v35  ;;  %773 = vmatpush3.msra.mxu0 %v238_v34  ;;  %v410_v34 = vld [vmem:[#allocation2 + $0x220] sm:$0xff] }
  0x32   :  { %213 = vperm.xlu0 %918, %v25_v30   ;;  %774 = vmatprep.subr.mxu0 %v944_v0  ;;  %v414_v30 = vld [vmem:[#allocation2 + $0x240] sm:$0xff] }
  0x33   :  { %775 = vmatpush3.msra.mxu0 %v237_v36  ;;  %v409_v36 = vld [vmem:[#allocation2 + $0x218] sm:$0xff] }
  0x34   :  { %776 = vmatprep.subr.mxu0 %v944_v0 }
  0x35   :  { %777 = vmatpush3.msra.mxu0 %v236_v37 }
  0x36   :  { %778 = vmatprep.subr.mxu0 %v944_v0 }
  0x37   :  { %779 = vmatpush3.msra.mxu0 %v235_v38  ;;  %v408_v38 = vld [vmem:[#allocation2 + $0x210] sm:$0xff] }
  0x38   :  { %780 = vmatprep.subr.mxu0 %v944_v0 }
  0x39   :  { %781 = vmatpush3.msra.mxu0 %v234_v39  ;;  %v407_v39 = vld [vmem:[#allocation2 + $0x208] sm:$0xff] }
  0x3a   :  { %782 = vmatprep.subr.mxu0 %v944_v0 }
  0x3b   :  { %783 = vmatpush3.msra.mxu0 %v233_v40  ;;  %v406_v40 = vld [vmem:[#allocation2 + $0x200] sm:$0xff] }
  0x3c   :  { %784 = vmatprep.subr.mxu0 %v944_v0 }
  0x3d   :  { %785 = vmatpush3.msra.mxu0 %v232_v52  ;;  %v502_v52 = vld [vmem:[#allocation2 + $0x2a0] sm:$0xff] }
  0x3e   :  { %786 = vmatprep.subr.mxu0 %v944_v0 }
  0x3f   :  { %787 = vmatpush3.msra.mxu0 %v231_v54  ;;  %v325_v54 = vlaneseq }
  0x40   :  { %788 = vmatprep.subr.mxu0 %v944_v0 }
  0x41   :  { %789 = vmatpush3.msra.mxu0 %v230_v56 }
  0x42   :  { %790 = vmatprep.subr.mxu0 %v944_v0 }
  0x43   :  { %791 = vmatpush3.msra.mxu0 %v229_v58 }
  0x44   :  { %792 = vmatprep.subr.mxu0 %v944_v0 }
  0x45   :  { %793 = vmatpush3.msra.mxu0 %v228_v60 }
  0x46   :  { %794 = vmatprep.subr.mxu0 %v944_v0 }
  0x47   :  { %795 = vmatpush3.msra.mxu0 %v227_v62 }
  0x48   :  { %796 = vmatprep.subr.mxu0 %v944_v0 }
  0x49   :  { %797 = vmatpush3.msra.mxu0 %v226_v1  ;;  %v500_v1 = vld [vmem:[#allocation2 + $0x290] sm:$0xff] }
  0x4a   :  { %798 = vmatprep.subr.mxu0 %v944_v0 }
  0x4b   :  { %799 = vmatpush3.msra.mxu0 %v225_v3  ;;  %v498_v3 = vld [vmem:[#allocation2 + $0x280] sm:$0xff] }
  0x4c   :  { %800 = vmatprep.subr.mxu0 %v944_v0 }
  0x4d   :  { %801 = vmatpush3.msra.mxu0 %v224_v5 }
  0x4e   :  { %802 = vmatprep.subr.mxu0 %v944_v0 }
  0x4f   :  { %803 = vmatpush3.msra.mxu0 %v223_v7 }
  0x50   :  { %842 = vmatprep.subr.mxu0 %v944_v0 }
  0xad   :  { %v214_v14 = vpop.permute.xlu0 %213 }
  0xef   :  { %v114_v42 = vpop.f32.mrf.mxu0 }
  0xf0   :  { %v115_v43 = vadd.f32 %v595_v41, %v114_v42  ;;  %v513_v41 = vld [vmem:[#allocation2 + $0x2f8] sm:$0xff]  ;;  %v512_v42 = vld [vmem:[#allocation2 + $0x2f0] sm:$0xff] }
  0xf1   :  { %v736_v44 = vpop.f32.mrf.mxu0 }
  0xf2   :  { %v118_v45 = vmax.f32 %v115_v43, 0.0  ;;  %v511_v43 = vld [vmem:[#allocation2 + $0x2e8] sm:$0xff]  ;;  %v510_v44 = vld [vmem:[#allocation2 + $0x2e0] sm:$0xff] }
  0xf4   :  { %770 = vmatmul.mubr.f32.vlgmr.msra.gmra.mxu1 %v118_v45  ;;  %v509_v45 = vld [vmem:[#allocation2 + $0x2d8] sm:$0xff] }
  0xf5   :  { %808 = vmatpush3.msra.mxu1 %v324_v46  ;;  %839 = vmatprep.mubr.msk.f32.mxu1 %vm945_vm0, %v944_v0  ;;  %v508_v46 = vld [vmem:[#allocation2 + $0x2d0] sm:$0xff] }
  0xf6   :  { %809 = vmatprep.subr.mxu1 %v944_v0 }
  0xf7   :  { %810 = vmatpush3.msra.mxu1 %v323_v47  ;;  %v507_v47 = vld [vmem:[#allocation2 + $0x2c8] sm:$0xff] }
  0xf8   :  { %811 = vmatprep.subr.mxu1 %v944_v0 }
  0xf9   :  { %812 = vmatpush3.msra.mxu1 %v322_v48  ;;  %v506_v48 = vld [vmem:[#allocation2 + $0x2c0] sm:$0xff] }
  0xfa   :  { %813 = vmatprep.subr.mxu1 %v944_v0 }
  0xfb   :  { %814 = vmatpush3.msra.mxu1 %v321_v49  ;;  %v505_v49 = vld [vmem:[#allocation2 + $0x2b8] sm:$0xff] }
  0xfc   :  { %815 = vmatprep.subr.mxu1 %v944_v0 }
  0xfd   :  { %816 = vmatpush3.msra.mxu1 %v320_v50  ;;  %v504_v50 = vld [vmem:[#allocation2 + $0x2b0] sm:$0xff] }
  0xfe   :  { %817 = vmatprep.subr.mxu1 %v944_v0 }
  0xff   :  { %818 = vmatpush3.msra.mxu1 %v319_v51  ;;  %v503_v51 = vld [vmem:[#allocation2 + $0x2a8] sm:$0xff] }
 0x100   :  { %819 = vmatprep.subr.mxu1 %v944_v0 }
 0x101   :  { %820 = vmatpush3.msra.mxu1 %v318_v53  ;;  %v501_v53 = vld [vmem:[#allocation2 + $0x298] sm:$0xff] }
 0x102   :  { %821 = vmatprep.subr.mxu1 %v944_v0 }
 0x103   :  { %822 = vmatpush3.msra.mxu1 %v317_v55  ;;  %v326_v55 = vshrl.u32 %v325_v54, 7 }
 0x104   :  { %823 = vmatprep.subr.mxu1 %v944_v0 }
 0x105   :  { %824 = vmatpush3.msra.mxu1 %v316_v57  ;;  %v327_v56 = vsub.s32 0, %v326_v55 }
 0x106   :  { %825 = vmatprep.subr.mxu1 %v944_v0 }
 0x107   :  { %826 = vmatpush3.msra.mxu1 %v315_v59  ;;  %v597_v59 = vld [vmem:[#allocation2 + $0x302] ss:$0 sm:$0xff] }
 0x108   :  { %827 = vmatprep.subr.mxu1 %v944_v0 }
 0x109   :  { %828 = vmatpush3.msra.mxu1 %v314_v61 }
 0x10a   :  { %829 = vmatprep.subr.mxu1 %v944_v0 }
 0x10b   :  { %830 = vmatpush3.msra.mxu1 %v313_v63 }
 0x10c   :  { %831 = vmatprep.subr.mxu1 %v944_v0 }
 0x10d   :  { %832 = vmatpush3.msra.mxu1 %v312_v2  ;;  %v499_v2 = vld [vmem:[#allocation2 + $0x288] sm:$0xff] }
 0x10e   :  { %833 = vmatprep.subr.mxu1 %v944_v0 }
 0x10f   :  { %834 = vmatpush3.msra.mxu1 %v311_v4  ;;  %v598_v4 = vld [vmem:[#allocation2 + $0x303] ss:$0 sm:$0xff] }
 0x110   :  { %835 = vmatprep.subr.mxu1 %v944_v0 }
 0x111   :  { %836 = vmatpush3.msra.mxu1 %v310_v6 }
 0x112   :  { %837 = vmatprep.subr.mxu1 %v944_v0 }
 0x113   :  { %838 = vmatpush3.msra.mxu1 %v309_v8 }
 0x114   :  { %840 = vmatmul.mubr.f32.vlgmr.msra.gmra.mxu1 %v26_v9  ;;  %877 = vmatprep.subr.mxu1 %v944_v0  ;;  %v599_v9 = vld [vmem:[#allocation2 + $0x304] ss:$0 sm:$0xff] }
 0x115   :  { %909 = vmatprep.mubr.msk.f32.mxu1 %vm945_vm0, %v944_v0  ;;  %878 = vmatpush3.msra.mxu1 %v513_v41 }
 0x116   :  { %879 = vmatprep.subr.mxu1 %v944_v0 }
 0x117   :  { %880 = vmatpush3.msra.mxu1 %v512_v42 }
 0x118   :  { %881 = vmatprep.subr.mxu1 %v944_v0 }
 0x119   :  { %882 = vmatpush3.msra.mxu1 %v511_v43 }
 0x11a   :  { %883 = vmatprep.subr.mxu1 %v944_v0 }
 0x11b   :  { %884 = vmatpush3.msra.mxu1 %v510_v44 }
 0x11c   :  { %885 = vmatprep.subr.mxu1 %v944_v0 }
 0x11d   :  { %886 = vmatpush3.msra.mxu1 %v509_v45 }
 0x11e   :  { %887 = vmatprep.subr.mxu1 %v944_v0 }
 0x11f   :  { %888 = vmatpush3.msra.mxu1 %v508_v46 }
 0x120   :  { %889 = vmatprep.subr.mxu1 %v944_v0 }
 0x121   :  { %890 = vmatpush3.msra.mxu1 %v507_v47 }
 0x122   :  { %891 = vmatprep.subr.mxu1 %v944_v0 }
 0x123   :  { %892 = vmatpush3.msra.mxu1 %v506_v48 }
 0x124   :  { %893 = vmatprep.subr.mxu1 %v944_v0 }
 0x125   :  { %894 = vmatpush3.msra.mxu1 %v505_v49 }
 0x126   :  { %895 = vmatprep.subr.mxu1 %v944_v0 }
 0x127   :  { %896 = vmatpush3.msra.mxu1 %v504_v50 }
 0x128   :  { %897 = vmatprep.subr.mxu1 %v944_v0 }
 0x129   :  { %898 = vmatpush3.msra.mxu1 %v503_v51 }
 0x12a   :  { %899 = vmatprep.subr.mxu1 %v944_v0 }
 0x12b   :  { %900 = vmatpush3.msra.mxu1 %v502_v52 }
 0x12c   :  { %901 = vmatprep.subr.mxu1 %v944_v0 }
 0x12d   :  { %902 = vmatpush3.msra.mxu1 %v501_v53 }
 0x12e   :  { %903 = vmatprep.subr.mxu1 %v944_v0 }
 0x12f   :  { %904 = vmatpush3.msra.mxu1 %v500_v1 }
 0x130   :  { %905 = vmatprep.subr.mxu1 %v944_v0 }
 0x131   :  { %906 = vmatpush3.msra.mxu1 %v499_v2 }
 0x132   :  { %907 = vmatprep.subr.mxu1 %v944_v0 }
 0x133   :  { %908 = vmatpush3.msra.mxu1 %v498_v3 }
 0x1b4   :  { %v206_v11 = vpop.f32.mrf.mxu1 }
 0x1b5   :  { %v207_v12 = vadd.f32 %v596_v10, %v206_v11 }
 0x1b6   :  { %v771_v13 = vpop.f32.mrf.mxu1 }
 0x1b7   :  { %v210_v15 = vmax.f32 %v207_v12, 0.0 }
 0x1b9   :  { %v216_v16 = vmul.f32 %v214_v14, %v210_v15 }
 0x1bb   :  { %v217_v17 = vrot.slane %v216_v16, 4 }
 0x1bd   :  { %v218_v18 = vadd.f32 %v217_v17, %v216_v16 }
 0x1bf   :  { %v219_v19 = vrot.slane %v218_v18, 2 }
 0x1c1   :  { %v220_v20 = vadd.f32 %v219_v19, %v218_v18 }
 0x1c3   :  { %v221_v21 = vrot.slane %v220_v20, 1 }
 0x1c5   :  { %v222_v22 = vadd.f32 %v221_v21, %v220_v20 }
 0x1c7   :  { %805 = vmatmul.mubr.f32.vlgmr.msra.gmra.mxu0 %v222_v22 }
 0x1c8   :  { %843 = vmatpush3.msra.mxu0 %v421_v23  ;;  %874 = vmatprep.mubr.msk.f32.mxu0 %vm945_vm0, %v944_v0 }
 0x1c9   :  { %844 = vmatprep.subr.mxu0 %v944_v0 }
 0x1ca   :  { %845 = vmatpush3.msra.mxu0 %v420_v24 }
 0x1cb   :  { %846 = vmatprep.subr.mxu0 %v944_v0 }
 0x1cc   :  { %847 = vmatpush3.msra.mxu0 %v419_v25 }
 0x1cd   :  { %848 = vmatprep.subr.mxu0 %v944_v0 }
 0x1ce   :  { %849 = vmatpush3.msra.mxu0 %v418_v26 }
 0x1cf   :  { %850 = vmatprep.subr.mxu0 %v944_v0 }
 0x1d0   :  { %851 = vmatpush3.msra.mxu0 %v417_v27 }
 0x1d1   :  { %852 = vmatprep.subr.mxu0 %v944_v0 }
 0x1d2   :  { %853 = vmatpush3.msra.mxu0 %v416_v28 }
 0x1d3   :  { %854 = vmatprep.subr.mxu0 %v944_v0 }
 0x1d4   :  { %855 = vmatpush3.msra.mxu0 %v415_v29  ;;  %v395_v35 = vpop.f32.mrf.mxu1 }
 0x1d5   :  { %856 = vmatprep.subr.mxu0 %v944_v0 }
 0x1d6   :  { %857 = vmatpush3.msra.mxu0 %v414_v30  ;;  %v841_v37 = vpop.f32.mrf.mxu1 }
 0x1d7   :  { %858 = vmatprep.subr.mxu0 %v944_v0 }
 0x1d8   :  { %859 = vmatpush3.msra.mxu0 %v413_v31 }
 0x1d9   :  { %860 = vmatprep.subr.mxu0 %v944_v0 }
 0x1da   :  { %861 = vmatpush3.msra.mxu0 %v412_v32 }
 0x1db   :  { %862 = vmatprep.subr.mxu0 %v944_v0 }
 0x1dc   :  { %863 = vmatpush3.msra.mxu0 %v411_v33 }
 0x1dd   :  { %864 = vmatprep.subr.mxu0 %v944_v0 }
 0x1de   :  { %865 = vmatpush3.msra.mxu0 %v410_v34 }
 0x1df   :  { %866 = vmatprep.subr.mxu0 %v944_v0 }
 0x1e0   :  { %867 = vmatpush3.msra.mxu0 %v409_v36 }
 0x1e1   :  { %868 = vmatprep.subr.mxu0 %v944_v0 }
 0x1e2   :  { %869 = vmatpush3.msra.mxu0 %v408_v38 }
 0x1e3   :  { %870 = vmatprep.subr.mxu0 %v944_v0 }
 0x1e4   :  { %871 = vmatpush3.msra.mxu0 %v407_v39 }
 0x1e5   :  { %872 = vmatprep.subr.mxu0 %v944_v0 }
 0x1e6   :  { %873 = vmatpush3.msra.mxu0 %v406_v40 }
 0x287   :  { %v305_v57 = vpop.f32.mrf.mxu0 }
 0x288   :  { %v328_v58 = vrot.slane %v305_v57, %v327_v56 }
 0x289   :  { %v806_v60 = vpop.f32.mrf.mxu0 }
 0x28a   :  { %v396_v61 = vadd.f32 %v395_v35, %v328_v58 }
 0x28c   :  { %v404_v62 = vadd.f32 %v597_v59, %v396_v61 }
 0x28e   :  { %v405_v63 = vmax.f32 %v404_v62, 0.0 }
 0x290   :  { %875 = vmatmul.mubr.f32.vlgmr.msra.gmra.mxu0 %v405_v63 }
 0x350   :  { %v493_v5 = vpop.f32.mrf.mxu0 }
 0x351   :  { %v494_v6 = vadd.f32 %v598_v4, %v493_v5 }
 0x352   :  { %v876_v7 = vpop.f32.mrf.mxu0 }
 0x353   :  { %v497_v8 = vmax.f32 %v494_v6, 0.0 }
 0x355   :  { %910 = vmatmul.mubr.f32.vlgmr.msra.gmra.mxu1 %v497_v8 }
 0x415   :  { %v585_v10 = vpop.f32.mrf.mxu1 }
 0x416   :  { %v586_v11 = vadd.f32 %v599_v9, %v585_v10 }
 0x417   :  { %v911_v12 = vpop.f32.mrf.mxu1 }
 0x418   :  { %589 = vst [vmem:[%s1084_s2] sm:$0xff] %v586_v11 }
 0x419   :  { %594 = vsyncpa [#allocation3], 1 }

</bundles_post_ra>
